<compile_context>
chip_gen: v6e
topology: v6e:2x2x1
jax: 0.10.0
libtpu: 0.0.40
codegen_flags: <defaults>
</compile_context>

<pallas_src>
import jax
import jax.numpy as jnp
import numpy as np
from jax.experimental import pallas as pl
from jax.experimental.pallas import tpu as pltpu


# ------------------------------ Pallas kernel ------------------------------

def bignn_kernel(x_ref, pool_ref, adj_ref,
                 w1_ref, b1_ref, wg_ref, bg_ref, wla_ref, bla_ref,
                 out_ref):
    """One UniBlock4Tune forward pass per grid step (grid axis = TD/BU side).

    x_ref    : (N, Din)        bf16 node features                (shared across sides)
    pool_ref : (B, N)          bf16 row-normalized membership    (shared across sides)
    adj_ref  : (N, N)          bf16 D^-1/2 (A+I) D^-1/2          (per side)
    w1_ref   : (Din, Hp) bf16, b1_ref : (1, Hp) f32              (per side)
    wg_ref   : (L, Hp, Hp) bf16, bg_ref : (L, 1, Hp) f32         (per side)
    wla_ref  : (L, Hp, Hp) bf16, bla_ref: (1, Hp) f32            (per side)
    out_ref  : (B, Hp) f32     pooled graph embeddings           (per side)
    """
    f32 = jnp.float32
    bf16 = jnp.bfloat16

    x = x_ref[...]
    adj = adj_ref[...]

    # lin1 (dropout is identity in eval mode); bias add in f32.
    h = jnp.dot(x, w1_ref[...], preferred_element_type=f32) + b1_ref[...]

    num_layers = wg_ref.shape[0]
    acc = None
    for i in range(num_layers):
        # NaOp 'gcn': relu( A_hat @ h @ W_i + b_i ), relu/bias in f32 on the VPU.
        agg = jnp.dot(adj, h.astype(bf16), preferred_element_type=f32)
        h = jnp.dot(agg.astype(bf16), wg_ref[i], preferred_element_type=f32) + bg_ref[i]
        h = jnp.maximum(h, 0.0)
        # ScOp 'skip' = identity; dropout identity in eval mode.
        # LaOp 'concat' + linear folded in: concat(js) @ W_la == sum_i js[i] @ W_la[i]
        contrib = jnp.dot(h.astype(bf16), wla_ref[i], preferred_element_type=f32)
        acc = contrib if acc is None else acc + contrib
    acc = acc + bla_ref[...]

    # PoolOp 'global_mean': per-graph mean = pool @ acc
    out_ref[...] = jnp.dot(pool_ref[...], acc.astype(bf16), preferred_element_type=f32)


# ------------------------------ wrapper / glue ------------------------------

def _round_up(x, m):
    return ((x + m - 1) // m) * m


def _pad_axis(a, axis, target):
    pad = target - a.shape[axis]
    if pad <= 0:
        return a
    widths = [(0, 0)] * a.ndim
    widths[axis] = (0, pad)
    return jnp.pad(a, widths)


def _prepare_side(p, h_pad):
    """Zero-pad hidden dims to h_pad; weights -> bf16 (MXU inputs), biases stay f32."""
    w1 = _pad_axis(p["w1"], 1, h_pad).astype(jnp.bfloat16)
    b1 = _pad_axis(p["b1"], 1, h_pad).astype(jnp.float32)
    wg = _pad_axis(_pad_axis(p["wg"], 1, h_pad), 2, h_pad).astype(jnp.bfloat16)
    bg = _pad_axis(p["bg"], 2, h_pad).astype(jnp.float32)
    wla = _pad_axis(_pad_axis(p["wla"], 1, h_pad), 2, h_pad).astype(jnp.bfloat16)
    bla = _pad_axis(p["bla"], 1, h_pad).astype(jnp.float32)
    return w1, b1, wg, bg, wla, bla


def bignn4tune_forward(x, adj_td, adj_bu, pool, params_td, params_bu):
    N, din = x.shape
    B = pool.shape[0]
    H = params_td["w1"].shape[1]
    L = params_td["wg"].shape[0]
    h_pad = _round_up(max(H, 128), 128)   # lane-dense output / full MXU lanes

    # Stack TD/BU along a leading "side" axis; cast matmul operands to bf16.
    td = _prepare_side(params_td, h_pad)
    bu = _prepare_side(params_bu, h_pad)
    w1, b1, wg, bg, wla, bla = (jnp.stack([a, b]) for a, b in zip(td, bu))
    adj = jnp.stack([adj_td, adj_bu]).astype(jnp.bfloat16)     # (2, N, N)
    x_bf = x.astype(jnp.bfloat16)
    pool_bf = pool.astype(jnp.bfloat16)

    def shared(shape):
        nd = len(shape)
        return pl.BlockSpec(shape, lambda s: (0,) * nd)

    def per_side(shape):
        nd = len(shape)
        return pl.BlockSpec((None,) + shape, lambda s: (s,) + (0,) * nd)

    out = pl.pallas_call(
        bignn_kernel,
        out_shape=jax.ShapeDtypeStruct((2, B, h_pad), jnp.float32),
        grid=(2,),
        in_specs=[
            shared((N, din)),                 # x
            shared((B, N)),                   # pool
            per_side((N, N)),                 # adj
            per_side((din, h_pad)),           # w1
            per_side((1, h_pad)),             # b1
            per_side((L, h_pad, h_pad)),      # wg
            per_side((L, 1, h_pad)),          # bg
            per_side((L, h_pad, h_pad)),      # wla
            per_side((1, h_pad)),             # bla
        ],
        out_specs=per_side((B, h_pad)),
        compiler_params=pltpu.CompilerParams(
            dimension_semantics=("parallel",),
            vmem_limit_bytes=32 * 1024 * 1024,
        ),
    )(x_bf, pool_bf, adj, w1, b1, wg, bg, wla, bla)

    # Strip the zero padding and lay out as torch.cat((TD_h, BU_h), 1).
    return jnp.concatenate([out[0, :, :H], out[1, :, :H]], axis=1)


# -------------------- deterministic params & graph construction --------------------

def make_params(key, in_dim, hidden, num_layers):
    ks = jax.random.split(key, 6)
    w1 = jax.random.normal(ks[0], (in_dim, hidden), jnp.float32) / np.sqrt(in_dim)
    b1 = jax.random.normal(ks[1], (1, hidden), jnp.float32) * 0.01
    wg = jax.random.normal(ks[2], (num_layers, hidden, hidden), jnp.float32) / np.sqrt(hidden)
    bg = jax.random.normal(ks[3], (num_layers, 1, hidden), jnp.float32) * 0.01
    wla = jax.random.normal(ks[4], (num_layers, hidden, hidden), jnp.float32) / np.sqrt(num_layers * hidden)
    bla = jax.random.normal(ks[5], (1, hidden), jnp.float32) * 0.01
    return {"w1": w1, "b1": b1, "wg": wg, "bg": bg, "wla": wla, "bla": bla}


def normalized_adj(src, dst, n_nodes):
    """GCN-style D^-1/2 (A + I) D^-1/2 with messages flowing src -> dst (A[dst, src] = 1)."""
    a = jnp.zeros((n_nodes, n_nodes), jnp.float32)
    a = a.at[dst, src].set(1.0)
    a = a + jnp.eye(n_nodes, dtype=jnp.float32)
    deg = jnp.sum(a, axis=1)
    dinv = 1.0 / jnp.sqrt(deg)
    return dinv[:, None] * a * dinv[None, :]


def mean_pool_matrix(batch, n_graphs):
    onehot = (batch[None, :] == jnp.arange(n_graphs)[:, None]).astype(jnp.float32)  # (B, N)
    counts = jnp.sum(onehot, axis=1, keepdims=True)
    return onehot / counts


# ------------------------------ pure-JAX reference ------------------------------

def _uniblock_reference(x, adj, pool, p):
    h = x @ p["w1"] + p["b1"]
    acc = p["bla"]
    for i in range(p["wg"].shape[0]):
        h = jnp.maximum(adj @ h @ p["wg"][i] + p["bg"][i], 0.0)
        acc = acc + h @ p["wla"][i]
    return pool @ acc


def bignn_reference(x, adj_td, adj_bu, pool, p_td, p_bu):
    return jnp.concatenate([_uniblock_reference(x, adj_td, pool, p_td),
                            _uniblock_reference(x, adj_bu, pool, p_bu)], axis=1)


if __name__ == "__main__":
    # Small deterministic problem: 2 graphs (trees), 8 nodes each, in_dim=8, hidden=32, 3 layers.
    N, IN_DIM, HIDDEN, NUM_LAYERS, B = 16, 8, 32, 3, 2

    key = jax.random.PRNGKey(0)
    kx, ktd, kbu = jax.random.split(key, 3)

    x = jax.random.normal(kx, (N, IN_DIM), jnp.float32)

    # data.batch: graph membership per node
    batch = jnp.array([0] * 8 + [1] * 8, jnp.int32)

    # data.edge_index (top-down, parent -> child); BU_edge_index is the reverse direction.
    src = jnp.array([0, 0, 1, 1, 2, 2, 3, 8, 8, 9, 10, 10, 12, 13], jnp.int32)
    dst = jnp.array([1, 2, 3, 4, 5, 6, 7, 9, 10, 11, 12, 13, 14, 15], jnp.int32)

    adj_td = normalized_adj(src, dst, N)      # TD block uses data.edge_index
    adj_bu = normalized_adj(dst, src, N)      # BU block uses data.BU_edge_index (reversed)
    pool = mean_pool_matrix(batch, B)

    params_td = make_params(ktd, IN_DIM, HIDDEN, NUM_LAYERS)
    params_bu = make_params(kbu, IN_DIM, HIDDEN, NUM_LAYERS)

    fwd = jax.jit(bignn4tune_forward)
    out = jax.block_until_ready(fwd(x, adj_td, adj_bu, pool, params_td, params_bu))
    assert out.shape == (B, 2 * HIDDEN) and out.dtype == jnp.float32

    # Loose tolerance: kernel uses bf16 MXU inputs with f32 accumulation.
    ref = bignn_reference(x, adj_td, adj_bu, pool, params_td, params_bu)
    np.testing.assert_allclose(np.asarray(out), np.asarray(ref), rtol=0.1, atol=0.1)

    # TODO(synk): dropout layers are modeled in eval mode (identity); LayerNorm branch disabled
    # because args.with_layernorm=False in the concretized genotype/args.
    print("KERNEL_OK")
</pallas_src>

<mosaic_0001>
module attributes {stable_mosaic.version = 11 : i64} {
  func.func @bignn_kernel(%arg0: i32, %arg1: memref<16x8xbf16, #tpu.memory_space<vmem>>, %arg2: memref<2x16xbf16, #tpu.memory_space<vmem>>, %arg3: memref<1x16x16xbf16, #tpu.memory_space<vmem>>, %arg4: memref<1x8x128xbf16, #tpu.memory_space<vmem>>, %arg5: memref<1x1x128xf32, #tpu.memory_space<vmem>>, %arg6: memref<1x3x128x128xbf16, #tpu.memory_space<vmem>>, %arg7: memref<1x3x1x128xf32, #tpu.memory_space<vmem>>, %arg8: memref<1x3x128x128xbf16, #tpu.memory_space<vmem>>, %arg9: memref<1x1x128xf32, #tpu.memory_space<vmem>>, %arg10: memref<1x2x128xf32, #tpu.memory_space<vmem>>) attributes {dimension_semantics = [#tpu.dimension_semantics<parallel>], iteration_bounds = array<i64: 2>, scalar_prefetch = 0 : i64, scratch_operands = 0 : i64, tpu.core_type = #tpu.core_type<tc>, window_params = [{pipeline_mode = #tpu.pipeline_mode<synchronous>, transform_indices = @transform_0, window_bounds = array<i64: 16, 8>}, {pipeline_mode = #tpu.pipeline_mode<synchronous>, transform_indices = @transform_1, window_bounds = array<i64: 2, 16>}, {transform_indices = @transform_2, window_bounds = array<i64: 1, 16, 16>}, {transform_indices = @transform_3, window_bounds = array<i64: 1, 8, 128>}, {transform_indices = @transform_4, window_bounds = array<i64: 1, 1, 128>}, {transform_indices = @transform_5, window_bounds = array<i64: 1, 3, 128, 128>}, {transform_indices = @transform_6, window_bounds = array<i64: 1, 3, 1, 128>}, {transform_indices = @transform_7, window_bounds = array<i64: 1, 3, 128, 128>}, {transform_indices = @transform_8, window_bounds = array<i64: 1, 1, 128>}, {transform_indices = @transform_9, window_bounds = array<i64: 1, 2, 128>}]} {
    %c0 = arith.constant 0 : index
    %c0_0 = arith.constant 0 : index
    %0 = vector.load %arg1[%c0, %c0_0] : memref<16x8xbf16, #tpu.memory_space<vmem>>, vector<16x8xbf16>
    %c0_1 = arith.constant 0 : index
    %c0_2 = arith.constant 0 : index
    %c0_3 = arith.constant 0 : index
    %1 = vector.load %arg3[%c0_1, %c0_2, %c0_3] : memref<1x16x16xbf16, #tpu.memory_space<vmem>>, vector<1x16x16xbf16>
    %2 = vector.shape_cast %1 : vector<1x16x16xbf16> to vector<16x16xbf16>
    %c0_4 = arith.constant 0 : index
    %c0_5 = arith.constant 0 : index
    %c0_6 = arith.constant 0 : index
    %3 = vector.load %arg4[%c0_4, %c0_5, %c0_6] : memref<1x8x128xbf16, #tpu.memory_space<vmem>>, vector<1x8x128xbf16>
    %4 = vector.shape_cast %3 : vector<1x8x128xbf16> to vector<8x128xbf16>
    %cst = arith.constant dense<0.000000e+00> : vector<16x128xf32>
    %5 = tpu.matmul %0, %4, %cst {dimension_numbers = #tpu.dot_dimension_numbers<[1], [0], [0], [1], [0, 0, 1, 1], [], []>} : vector<16x8xbf16>, vector<8x128xbf16>, vector<16x128xf32> -> vector<16x128xf32>
    %c0_7 = arith.constant 0 : index
    %c0_8 = arith.constant 0 : index
    %c0_9 = arith.constant 0 : index
    %6 = vector.load %arg5[%c0_7, %c0_8, %c0_9] : memref<1x1x128xf32, #tpu.memory_space<vmem>>, vector<1x1x128xf32>
    %7 = vector.shape_cast %6 : vector<1x1x128xf32> to vector<1x128xf32>
    %8 = vector.broadcast %7 : vector<1x128xf32> to vector<16x128xf32>
    %9 = arith.addf %5, %8 : vector<16x128xf32>
    %10 = arith.truncf %9 : vector<16x128xf32> to vector<16x128xbf16>
    %cst_10 = arith.constant dense<0.000000e+00> : vector<16x128xf32>
    %11 = tpu.matmul %2, %10, %cst_10 {dimension_numbers = #tpu.dot_dimension_numbers<[1], [0], [0], [1], [0, 0, 1, 1], [], []>} : vector<16x16xbf16>, vector<16x128xbf16>, vector<16x128xf32> -> vector<16x128xf32>
    %12 = arith.truncf %11 : vector<16x128xf32> to vector<16x128xbf16>
    %c0_11 = arith.constant 0 : index
    %c0_12 = arith.constant 0 : index
    %c0_13 = arith.constant 0 : index
    %c0_14 = arith.constant 0 : index
    %13 = vector.load %arg6[%c0_11, %c0_12, %c0_13, %c0_14] : memref<1x3x128x128xbf16, #tpu.memory_space<vmem>>, vector<1x1x128x128xbf16>
    %14 = vector.shape_cast %13 : vector<1x1x128x128xbf16> to vector<128x128xbf16>
    %cst_15 = arith.constant dense<0.000000e+00> : vector<16x128xf32>
    %15 = tpu.matmul %12, %14, %cst_15 {dimension_numbers = #tpu.dot_dimension_numbers<[1], [0], [0], [1], [0, 0, 1, 1], [], []>} : vector<16x128xbf16>, vector<128x128xbf16>, vector<16x128xf32> -> vector<16x128xf32>
    %c0_16 = arith.constant 0 : index
    %c0_17 = arith.constant 0 : index
    %c0_18 = arith.constant 0 : index
    %c0_19 = arith.constant 0 : index
    %16 = vector.load %arg7[%c0_16, %c0_17, %c0_18, %c0_19] : memref<1x3x1x128xf32, #tpu.memory_space<vmem>>, vector<1x1x1x128xf32>
    %17 = vector.shape_cast %16 : vector<1x1x1x128xf32> to vector<1x128xf32>
    %18 = vector.broadcast %17 : vector<1x128xf32> to vector<16x128xf32>
    %19 = arith.addf %15, %18 : vector<16x128xf32>
    %cst_20 = arith.constant 0.000000e+00 : f32
    %20 = vector.broadcast %cst_20 : f32 to vector<16x128xf32>
    %21 = arith.maximumf %19, %20 : vector<16x128xf32>
    %22 = arith.truncf %21 : vector<16x128xf32> to vector<16x128xbf16>
    %c0_21 = arith.constant 0 : index
    %c0_22 = arith.constant 0 : index
    %c0_23 = arith.constant 0 : index
    %c0_24 = arith.constant 0 : index
    %23 = vector.load %arg8[%c0_21, %c0_22, %c0_23, %c0_24] : memref<1x3x128x128xbf16, #tpu.memory_space<vmem>>, vector<1x1x128x128xbf16>
    %24 = vector.shape_cast %23 : vector<1x1x128x128xbf16> to vector<128x128xbf16>
    %cst_25 = arith.constant dense<0.000000e+00> : vector<16x128xf32>
    %25 = tpu.matmul %22, %24, %cst_25 {dimension_numbers = #tpu.dot_dimension_numbers<[1], [0], [0], [1], [0, 0, 1, 1], [], []>} : vector<16x128xbf16>, vector<128x128xbf16>, vector<16x128xf32> -> vector<16x128xf32>
    %26 = arith.truncf %21 : vector<16x128xf32> to vector<16x128xbf16>
    %cst_26 = arith.constant dense<0.000000e+00> : vector<16x128xf32>
    %27 = tpu.matmul %2, %26, %cst_26 {dimension_numbers = #tpu.dot_dimension_numbers<[1], [0], [0], [1], [0, 0, 1, 1], [], []>} : vector<16x16xbf16>, vector<16x128xbf16>, vector<16x128xf32> -> vector<16x128xf32>
    %28 = arith.truncf %27 : vector<16x128xf32> to vector<16x128xbf16>
    %c0_27 = arith.constant 0 : index
    %c1 = arith.constant 1 : index
    %c0_28 = arith.constant 0 : index
    %c0_29 = arith.constant 0 : index
    %29 = vector.load %arg6[%c0_27, %c1, %c0_28, %c0_29] : memref<1x3x128x128xbf16, #tpu.memory_space<vmem>>, vector<1x1x128x128xbf16>
    %30 = vector.shape_cast %29 : vector<1x1x128x128xbf16> to vector<128x128xbf16>
    %cst_30 = arith.constant dense<0.000000e+00> : vector<16x128xf32>
    %31 = tpu.matmul %28, %30, %cst_30 {dimension_numbers = #tpu.dot_dimension_numbers<[1], [0], [0], [1], [0, 0, 1, 1], [], []>} : vector<16x128xbf16>, vector<128x128xbf16>, vector<16x128xf32> -> vector<16x128xf32>
    %c0_31 = arith.constant 0 : index
    %c1_32 = arith.constant 1 : index
    %c0_33 = arith.constant 0 : index
    %c0_34 = arith.constant 0 : index
    %32 = vector.load %arg7[%c0_31, %c1_32, %c0_33, %c0_34] : memref<1x3x1x128xf32, #tpu.memory_space<vmem>>, vector<1x1x1x128xf32>
    %33 = vector.shape_cast %32 : vector<1x1x1x128xf32> to vector<1x128xf32>
    %34 = vector.broadcast %33 : vector<1x128xf32> to vector<16x128xf32>
    %35 = arith.addf %31, %34 : vector<16x128xf32>
    %cst_35 = arith.constant 0.000000e+00 : f32
    %36 = vector.broadcast %cst_35 : f32 to vector<16x128xf32>
    %37 = arith.maximumf %35, %36 : vector<16x128xf32>
    %38 = arith.truncf %37 : vector<16x128xf32> to vector<16x128xbf16>
    %c0_36 = arith.constant 0 : index
    %c1_37 = arith.constant 1 : index
    %c0_38 = arith.constant 0 : index
    %c0_39 = arith.constant 0 : index
    %39 = vector.load %arg8[%c0_36, %c1_37, %c0_38, %c0_39] : memref<1x3x128x128xbf16, #tpu.memory_space<vmem>>, vector<1x1x128x128xbf16>
    %40 = vector.shape_cast %39 : vector<1x1x128x128xbf16> to vector<128x128xbf16>
    %cst_40 = arith.constant dense<0.000000e+00> : vector<16x128xf32>
    %41 = tpu.matmul %38, %40, %cst_40 {dimension_numbers = #tpu.dot_dimension_numbers<[1], [0], [0], [1], [0, 0, 1, 1], [], []>} : vector<16x128xbf16>, vector<128x128xbf16>, vector<16x128xf32> -> vector<16x128xf32>
    %42 = arith.addf %25, %41 : vector<16x128xf32>
    %43 = arith.truncf %37 : vector<16x128xf32> to vector<16x128xbf16>
    %cst_41 = arith.constant dense<0.000000e+00> : vector<16x128xf32>
    %44 = tpu.matmul %2, %43, %cst_41 {dimension_numbers = #tpu.dot_dimension_numbers<[1], [0], [0], [1], [0, 0, 1, 1], [], []>} : vector<16x16xbf16>, vector<16x128xbf16>, vector<16x128xf32> -> vector<16x128xf32>
    %45 = arith.truncf %44 : vector<16x128xf32> to vector<16x128xbf16>
    %c0_42 = arith.constant 0 : index
    %c2 = arith.constant 2 : index
    %c0_43 = arith.constant 0 : index
    %c0_44 = arith.constant 0 : index
    %46 = vector.load %arg6[%c0_42, %c2, %c0_43, %c0_44] : memref<1x3x128x128xbf16, #tpu.memory_space<vmem>>, vector<1x1x128x128xbf16>
    %47 = vector.shape_cast %46 : vector<1x1x128x128xbf16> to vector<128x128xbf16>
    %cst_45 = arith.constant dense<0.000000e+00> : vector<16x128xf32>
    %48 = tpu.matmul %45, %47, %cst_45 {dimension_numbers = #tpu.dot_dimension_numbers<[1], [0], [0], [1], [0, 0, 1, 1], [], []>} : vector<16x128xbf16>, vector<128x128xbf16>, vector<16x128xf32> -> vector<16x128xf32>
    %c0_46 = arith.constant 0 : index
    %c2_47 = arith.constant 2 : index
    %c0_48 = arith.constant 0 : index
    %c0_49 = arith.constant 0 : index
    %49 = vector.load %arg7[%c0_46, %c2_47, %c0_48, %c0_49] : memref<1x3x1x128xf32, #tpu.memory_space<vmem>>, vector<1x1x1x128xf32>
    %50 = vector.shape_cast %49 : vector<1x1x1x128xf32> to vector<1x128xf32>
    %51 = vector.broadcast %50 : vector<1x128xf32> to vector<16x128xf32>
    %52 = arith.addf %48, %51 : vector<16x128xf32>
    %cst_50 = arith.constant 0.000000e+00 : f32
    %53 = vector.broadcast %cst_50 : f32 to vector<16x128xf32>
    %54 = arith.maximumf %52, %53 : vector<16x128xf32>
    %55 = arith.truncf %54 : vector<16x128xf32> to vector<16x128xbf16>
    %c0_51 = arith.constant 0 : index
    %c2_52 = arith.constant 2 : index
    %c0_53 = arith.constant 0 : index
    %c0_54 = arith.constant 0 : index
    %56 = vector.load %arg8[%c0_51, %c2_52, %c0_53, %c0_54] : memref<1x3x128x128xbf16, #tpu.memory_space<vmem>>, vector<1x1x128x128xbf16>
    %57 = vector.shape_cast %56 : vector<1x1x128x128xbf16> to vector<128x128xbf16>
    %cst_55 = arith.constant dense<0.000000e+00> : vector<16x128xf32>
    %58 = tpu.matmul %55, %57, %cst_55 {dimension_numbers = #tpu.dot_dimension_numbers<[1], [0], [0], [1], [0, 0, 1, 1], [], []>} : vector<16x128xbf16>, vector<128x128xbf16>, vector<16x128xf32> -> vector<16x128xf32>
    %59 = arith.addf %42, %58 : vector<16x128xf32>
    %c0_56 = arith.constant 0 : index
    %c0_57 = arith.constant 0 : index
    %c0_58 = arith.constant 0 : index
    %60 = vector.load %arg9[%c0_56, %c0_57, %c0_58] : memref<1x1x128xf32, #tpu.memory_space<vmem>>, vector<1x1x128xf32>
    %61 = vector.shape_cast %60 : vector<1x1x128xf32> to vector<1x128xf32>
    %62 = vector.broadcast %61 : vector<1x128xf32> to vector<16x128xf32>
    %63 = arith.addf %59, %62 : vector<16x128xf32>
    %c0_59 = arith.constant 0 : index
    %c0_60 = arith.constant 0 : index
    %64 = vector.load %arg2[%c0_59, %c0_60] : memref<2x16xbf16, #tpu.memory_space<vmem>>, vector<2x16xbf16>
    %65 = arith.truncf %63 : vector<16x128xf32> to vector<16x128xbf16>
    %cst_61 = arith.constant dense<0.000000e+00> : vector<2x128xf32>
    %66 = tpu.matmul %64, %65, %cst_61 {dimension_numbers = #tpu.dot_dimension_numbers<[1], [0], [0], [1], [0, 0, 1, 1], [], []>} : vector<2x16xbf16>, vector<16x128xbf16>, vector<2x128xf32> -> vector<2x128xf32>
    %c0_62 = arith.constant 0 : index
    %c0_63 = arith.constant 0 : index
    %c0_64 = arith.constant 0 : index
    %67 = vector.load %arg10[%c0_62, %c0_63, %c0_64] : memref<1x2x128xf32, #tpu.memory_space<vmem>>, vector<1x2x128xf32>
    %68 = vector.shape_cast %67 : vector<1x2x128xf32> to vector<2x128xf32>
    %69 = vector.shape_cast %66 : vector<2x128xf32> to vector<1x2x128xf32>
    tpu.vector_store %arg10[%c0_62, %c0_63, %c0_64], %69 {strides = array<i32>} : memref<1x2x128xf32, #tpu.memory_space<vmem>>, vector<1x2x128xf32>,
    return
  }
  func.func @transform_0(%arg0: i32) -> (i32, i32) {
    %c0_i32 = arith.constant 0 : i32
    %c0_i32_0 = arith.constant 0 : i32
    %c0_i32_1 = arith.constant 0 : i32
    return %c0_i32, %c0_i32_0 : i32, i32
  }
  func.func @transform_1(%arg0: i32) -> (i32, i32) {
    %c0_i32 = arith.constant 0 : i32
    %c0_i32_0 = arith.constant 0 : i32
    %c0_i32_1 = arith.constant 0 : i32
    return %c0_i32, %c0_i32_0 : i32, i32
  }
  func.func @transform_2(%arg0: i32) -> (i32, i32, i32) {
    %c0_i32 = arith.constant 0 : i32
    %c0_i32_0 = arith.constant 0 : i32
    %c0_i32_1 = arith.constant 0 : i32
    return %arg0, %c0_i32, %c0_i32_0 : i32, i32, i32
  }
  func.func @transform_3(%arg0: i32) -> (i32, i32, i32) {
    %c0_i32 = arith.constant 0 : i32
    %c0_i32_0 = arith.constant 0 : i32
    %c0_i32_1 = arith.constant 0 : i32
    return %arg0, %c0_i32, %c0_i32_0 : i32, i32, i32
  }
  func.func @transform_4(%arg0: i32) -> (i32, i32, i32) {
    %c0_i32 = arith.constant 0 : i32
    %c0_i32_0 = arith.constant 0 : i32
    %c0_i32_1 = arith.constant 0 : i32
    return %arg0, %c0_i32, %c0_i32_0 : i32, i32, i32
  }
  func.func @transform_5(%arg0: i32) -> (i32, i32, i32, i32) {
    %c0_i32 = arith.constant 0 : i32
    %c0_i32_0 = arith.constant 0 : i32
    %c0_i32_1 = arith.constant 0 : i32
    %c0_i32_2 = arith.constant 0 : i32
    return %arg0, %c0_i32, %c0_i32_0, %c0_i32_1 : i32, i32, i32, i32
  }
  func.func @transform_6(%arg0: i32) -> (i32, i32, i32, i32) {
    %c0_i32 = arith.constant 0 : i32
    %c0_i32_0 = arith.constant 0 : i32
    %c0_i32_1 = arith.constant 0 : i32
    %c0_i32_2 = arith.constant 0 : i32
    return %arg0, %c0_i32, %c0_i32_0, %c0_i32_1 : i32, i32, i32, i32
  }
  func.func @transform_7(%arg0: i32) -> (i32, i32, i32, i32) {
    %c0_i32 = arith.constant 0 : i32
    %c0_i32_0 = arith.constant 0 : i32
    %c0_i32_1 = arith.constant 0 : i32
    %c0_i32_2 = arith.constant 0 : i32
    return %arg0, %c0_i32, %c0_i32_0, %c0_i32_1 : i32, i32, i32, i32
  }
  func.func @transform_8(%arg0: i32) -> (i32, i32, i32) {
    %c0_i32 = arith.constant 0 : i32
    %c0_i32_0 = arith.constant 0 : i32
    %c0_i32_1 = arith.constant 0 : i32
    return %arg0, %c0_i32, %c0_i32_0 : i32, i32, i32
  }
  func.func @transform_9(%arg0: i32) -> (i32, i32, i32) {
    %c0_i32 = arith.constant 0 : i32
    %c0_i32_0 = arith.constant 0 : i32
    %c0_i32_1 = arith.constant 0 : i32
    return %arg0, %c0_i32, %c0_i32_0 : i32, i32, i32
  }
}

</mosaic_0001>

<bundles_post_ra>
// kernel: bignn4tune_forward.1
= control target key start
LH: loop header
LB: loop body
LE: loop exit
PB: predicated region body
PF: predicated region fallthrough
CT: control target
= control target key end

     0   :  { %s1954_s30 = smov 0   ;;  %s2155_s0 = inlined_call_operand.vmem [shape: bf16[16,8], index: 0, kind: input, shape index: {}]   ;;  %s2156_s1 = inlined_call_operand.vmem [shape: bf16[2,16], index: 1, kind: input, shape index: {}]   ;;  %s2157_s2 = inlined_call_operand.vmem [shape: bf16[2,16,16], index: 2, kind: input, shape index: {}]   ;;  %s2158_s3 = inlined_call_operand.vmem [shape: bf16[2,8,128], index: 3, kind: input, shape index: {}]   ;;  %s2159_s4 = inlined_call_operand.vmem [shape: f32[2,1,128], index: 4, kind: input, shape index: {}]   ;;  %s2160_s5 = inlined_call_operand.vmem [shape: bf16[2,3,128,128], index: 5, kind: input, shape index: {}]   ;;  %s2161_s6 = inlined_call_operand.vmem [shape: f32[2,3,1,128], index: 6, kind: input, shape index: {}]   ;;  %s2162_s7 = inlined_call_operand.vmem [shape: bf16[2,3,128,128], index: 7, kind: input, shape index: {}]   ;;  %s2163_s8 = inlined_call_operand.vmem [shape: f32[2,1,128], index: 8, kind: input, shape index: {}]   ;;  %s2164_s9 = inlined_call_operand.vmem [shape: f32[2,2,128], index: 9, kind: output, shape index: {}]  }
   0x1 LB: > { %s1478_s10 = sadd.s32 4294967295, %s1900_s30   ;;  %p1482_p0 = scmp.ge.s32.totalorder %s1900_s30, 1  ;;  %s1900_s30 = sphi %s1954_s30, %s19_s30  }
   0x2   : > { %p341_p1 = scmp.lt.s32.totalorder %s1900_s30, 3 }
   0x4   : > { %p342_p2 = pnand %p1482_p0, %p341_p1 }
   0x5   : > { %p400_p3 = scmp.lt.s32.totalorder (!%p342_p2), %s1478_s10, 1 }
   0x6   : > { %345 = sbr.rel (%p342_p2) target bundleno = 1845 (0x735), region = 56 }
   0xb   : > { %v1902_v0 = vmov 0.0   ;;  %vm1903_vm0 = vmmov 0   ;;  %s2166_s10 = smov (!%p400_p3, %s1478_s10), 1  ;;  %vm455_vm1 = vcmask 1043456   ;;  %v1844_v2 = vld [vmem:[%s2155_s0] sm:$0xff]   ;;  %vm451_vm2 = vcmask 64512  }
   0xc   : > { %1682 = vmatprep.subr.bf16.mxu0 %v1902_v0  ;;  %1684 = vmatprep.mubr.msk.bf16.mxu0 %vm1903_vm0, %v1902_v0  ;;  %s1485_s11 = sshll.u32 %s2166_s10, 2  ;;  %s1832_s12 = smul.u32 192, %s2166_s10  ;;  %vm506_vm3 = vcmask 130048  }
   0xd   : > { %1688 = vmatprep.subr.bf16.mxu1 %v1902_v0  ;;  %1690 = vmatprep.mubr.msk.bf16.mxu1 %vm1903_vm0, %v1902_v0  ;;  %s408_s15 = scalar_lea.vmem %s2158_s3, %s1485_s11  ;;  %s1617_s24 = sshll.u32 %s2166_s10, 3 }
   0xe   : > { %s1978_s18 = scalar_lea.vmem %s2160_s5, %s1832_s12  ;;  %v438_v1 = vld [vmem:[%s408_s15] sm:$0xf]  ;;  %s1989_s23 = scalar_lea.vmem %s2162_s7, %s1832_s12 }
   0xf   : > { %v457_v3 = vsel %vm455_vm1, %v438_v1, 0  ;;  %s404_s27 = scalar_lea.vmem %s2157_s2, %s1617_s24  ;;  %v1846_v4 = vld [vmem:[%s1978_s18 + $0x38] sm:$0xff]   ;;  %v1847_v5 = vld [vmem:[%s1978_s18 + $0x30] sm:$0xff]   ;;  %v1848_v6 = vld [vmem:[%s1978_s18 + $0x28] sm:$0xff]   ;;  %s411_s11 = scalar_lea.vmem %s2159_s4, %s2166_s10 }
  0x10   : > { %1683 = vmatpush3.bf16.msra.mxu0 %v457_v3  ;;  %v1849_v7 = vld [vmem:[%s1978_s18 + $0x20] sm:$0xff]   ;;  %v1850_v8 = vld [vmem:[%s1978_s18 + $0x18] sm:$0xff]   ;;  %v1851_v9 = vld [vmem:[%s1978_s18 + $0x10] sm:$0xff]   ;;  %s1833_s12 = smul.u32 3, %s2166_s10  ;;  %s1488_s21 = sshll.u32 %s2166_s10, 1 }
  0x11   : > { %1694 = vmatprep.subr.bf16.mxu0 %v1902_v0  ;;  %v1489_v11 = vld [vmem:[%s411_s11] ss:$0 sm:$0xff]  ;;  %v1852_v19 = vld [vmem:[%s1978_s18 + $0x8] sm:$0xff]   ;;  %v1854_v36 = vld [vmem:[%s1978_s18 + $0x78] sm:$0xff]   ;;  %s432_s24 = scalar_lea.vmem %s2164_s9, %s1488_s21 }
  0x12   : > { %v2011_v18 = vld [vmem:[%s404_s27] sm:$0xff]   ;;  %s2028_s15 = scalar_lea.vmem %s2161_s6, %s1833_s12  ;;  %v1855_v37 = vld [vmem:[%s1978_s18 + $0x70] sm:$0xff]   ;;  %v1856_v38 = vld [vmem:[%s1978_s18 + $0x68] sm:$0xff]  }
  0x13   : > { %1685 = vmatmul.mubr.msk.bf16.vlgmr.msra.gmra.mxu0 %vm451_vm2, %v1844_v2  ;;  %v1853_v20 = vld [vmem:[%s1978_s18] sm:$0xff]   ;;  %v1858_v40 = vld [vmem:[%s1978_s18 + $0x58] sm:$0xff]   ;;  %v1859_v41 = vld [vmem:[%s1978_s18 + $0x50] sm:$0xff]  }
  0x14   : > { %1710 = vmatprep.mubr.msk.bf16.mxu0 %vm1903_vm0, %v1902_v0  ;;  %1695 = vmatpush3.bf16.msra.mxu0 %v1846_v4  ;;  %v1494_v26 = vld [vmem:[%s2028_s15] ss:$0 sm:$0xff]  ;;  %v1860_v42 = vld [vmem:[%s1978_s18 + $0x48] sm:$0xff]   ;;  %v1870_v44 = vld [vmem:[%s1989_s23 + $0x78] sm:$0xff]  }
  0x15   : > { %1696 = vmatprep.subr.bf16.mxu0 %v1902_v0  ;;  %v1857_v39 = vld [vmem:[%s1978_s18 + $0x60] sm:$0xff]   ;;  %v1871_v45 = vld [vmem:[%s1989_s23 + $0x70] sm:$0xff]   ;;  %v1872_v46 = vld [vmem:[%s1989_s23 + $0x68] sm:$0xff]  }
  0x16   : > { %v1861_v43 = vld [vmem:[%s1978_s18 + $0x40] sm:$0xff]   ;;  %v1874_v48 = vld [vmem:[%s1989_s23 + $0x58] sm:$0xff]   ;;  %v1875_v49 = vld [vmem:[%s1989_s23 + $0x50] sm:$0xff]  }
  0x17   : > { %v1873_v47 = vld [vmem:[%s1989_s23 + $0x60] sm:$0xff]   ;;  %v1862_v53 = vld [vmem:[%s1989_s23 + $0x38] sm:$0xff]   ;;  %v1863_v56 = vld [vmem:[%s1989_s23 + $0x30] sm:$0xff]  }
  0x18   : > { %1697 = vmatpush3.bf16.msra.mxu0 %v1847_v5  ;;  %v1864_v57 = vld [vmem:[%s1989_s23 + $0x28] sm:$0xff]   ;;  %v1865_v58 = vld [vmem:[%s1989_s23 + $0x20] sm:$0xff]   ;;  %v1866_v59 = vld [vmem:[%s1989_s23 + $0x18] sm:$0xff]  }
  0x19   : > { %1698 = vmatprep.subr.bf16.mxu0 %v1902_v0  ;;  %v1867_v60 = vld [vmem:[%s1989_s23 + $0x10] sm:$0xff]   ;;  %v1868_v61 = vld [vmem:[%s1989_s23 + $0x8] sm:$0xff]   ;;  %v1869_v62 = vld [vmem:[%s1989_s23] sm:$0xff]  }
  0x1a   : > { %v1876_v63 = vld [vmem:[%s1989_s23 + $0x48] sm:$0xff]   ;;  %v1877_v1 = vld [vmem:[%s1989_s23 + $0x40] sm:$0xff]  }
  0x1b   : > { %v1521_v2 = vld [vmem:[%s2028_s15 + $0x1] ss:$0 sm:$0xff] }
  0x1c   : > { %1699 = vmatpush3.bf16.msra.mxu0 %v1848_v6 }
  0x1d   : > { %1700 = vmatprep.subr.bf16.mxu0 %v1902_v0 }
  0x20   : > { %1701 = vmatpush3.bf16.msra.mxu0 %v1849_v7 }
  0x21   : > { %1702 = vmatprep.subr.bf16.mxu0 %v1902_v0 }
  0x24   : > { %1703 = vmatpush3.bf16.msra.mxu0 %v1850_v8 }
  0x25   : > { %1704 = vmatprep.subr.bf16.mxu0 %v1902_v0 }
  0x28   : > { %1705 = vmatpush3.bf16.msra.mxu0 %v1851_v9 }
  0x29   : > { %1706 = vmatprep.subr.bf16.mxu0 %v1902_v0 }
  0x2c   : > { %1707 = vmatpush3.bf16.msra.mxu0 %v1852_v19 }
  0x2d   : > { %1708 = vmatprep.subr.bf16.mxu0 %v1902_v0 }
  0x30   : > { %1709 = vmatpush3.bf16.msra.mxu0 %v1853_v20  ;;  %v1882_v20 = vld [vmem:[%s1978_s18 + $0x98] sm:$0xff]  }
  0x31   : > { %1740 = vmatprep.subr.bf16.mxu0 %v1902_v0 }
  0xd3   : > { %v493_v10 = vpop.f32.mrf.mxu0 }
  0xd4   : > { %v494_v14 = vadd.f32 %v1489_v11, %v493_v10 }
  0xd5   : > { %v1686_v12 = vpop.f32.mrf.mxu0 }
  0xd6   : > { %v1878_v12 = vld [vmem:[%s1978_s18 + $0xb8] sm:$0xff]  }
  0xd7   : > { %v496_v13 = vpop.f32.mrf.mxu0 }
  0xd8   : > { %v497_v15 = vadd.f32 %v1489_v11, %v496_v13  ;;  %v1879_v13 = vld [vmem:[%s1978_s18 + $0xb0] sm:$0xff]  }
  0xd9   : > { %v1687_v16 = vpop.f32.mrf.mxu0 }
  0xda   : > { %v500_v17 = vpack.c.bf16 %v497_v15, %v494_v14  ;;  %v1880_v14 = vld [vmem:[%s1978_s18 + $0xa8] sm:$0xff]   ;;  %v1881_v15 = vld [vmem:[%s1978_s18 + $0xa0] sm:$0xff]  }
  0xdc   : > { %1689 = vmatpush3.bf16.msra.mxu1 %v500_v17 }
  0xdd   : > { %1714 = vmatprep.subr.bf16.mxu1 %v1902_v0 }
  0xdf   : > { %1691 = vmatmul.mubr.msk.bf16.vlgmr.msra.gmra.mxu1 %vm506_vm3, %v2011_v18 }
  0xe0   : > { %1716 = vmatprep.mubr.msk.bf16.mxu1 %vm1903_vm0, %v1902_v0 }
 0x19f   : > { %v544_v21 = vpop.f32.mrf.mxu1 }
 0x1a1   : > { %v1692_v22 = vpop.f32.mrf.mxu1 }
 0x1a2   : > { %v1884_v22 = vld [vmem:[%s1978_s18 + $0x88] sm:$0xff]  }
 0x1a3   : > { %v547_v23 = vpop.f32.mrf.mxu1 }
 0x1a4   : > { %v551_v24 = vpack.c.bf16 %v547_v23, %v544_v21  ;;  %v1883_v21 = vld [vmem:[%s1978_s18 + $0x90] sm:$0xff]   ;;  %v1885_v23 = vld [vmem:[%s1978_s18 + $0x80] sm:$0xff]   ;;  %s428_s18 = scalar_lea.vmem %s2163_s8, %s2166_s10 }
 0x1a5   : > { %v1693_v25 = vpop.f32.mrf.mxu1 }
 0x1a6   : > { %1711 = vmatmul.mubr.bf16.vlgmr.msra.gmra.mxu0 %v551_v24  ;;  %v1886_v24 = vld [vmem:[%s1989_s23 + $0xb8] sm:$0xff]   ;;  %v1887_v25 = vld [vmem:[%s1989_s23 + $0xb0] sm:$0xff]  }
 0x1a7   : > { %1756 = vmatprep.mubr.msk.bf16.mxu0 %vm1903_vm0, %v1902_v0  ;;  %1741 = vmatpush3.bf16.msra.mxu0 %v1870_v44 }
 0x1a8   : > { %1742 = vmatprep.subr.bf16.mxu0 %v1902_v0 }
 0x1ab   : > { %1743 = vmatpush3.bf16.msra.mxu0 %v1871_v45 }
 0x1ac   : > { %1744 = vmatprep.subr.bf16.mxu0 %v1902_v0 }
 0x1af   : > { %1745 = vmatpush3.bf16.msra.mxu0 %v1872_v46 }
 0x1b0   : > { %1746 = vmatprep.subr.bf16.mxu0 %v1902_v0 }
 0x1b3   : > { %1747 = vmatpush3.bf16.msra.mxu0 %v1873_v47 }
 0x1b4   : > { %1748 = vmatprep.subr.bf16.mxu0 %v1902_v0 }
 0x1b7   : > { %1749 = vmatpush3.bf16.msra.mxu0 %v1874_v48 }
 0x1b8   : > { %1750 = vmatprep.subr.bf16.mxu0 %v1902_v0 }
 0x1bb   : > { %1751 = vmatpush3.bf16.msra.mxu0 %v1875_v49 }
 0x1bc   : > { %1752 = vmatprep.subr.bf16.mxu0 %v1902_v0 }
 0x1bf   : > { %1753 = vmatpush3.bf16.msra.mxu0 %v1876_v63 }
 0x1c0   : > { %1754 = vmatprep.subr.bf16.mxu0 %v1902_v0 }
 0x1c3   : > { %1755 = vmatpush3.bf16.msra.mxu0 %v1877_v1 }
 0x1c4   : > { %1780 = vmatprep.subr.bf16.mxu0 %v1902_v0 }
 0x266   : > { %v657_v27 = vpop.f32.mrf.mxu0 }
 0x267   : > { %v658_v29 = vadd.f32 %v1494_v26, %v657_v27  ;;  %v1889_v27 = vld [vmem:[%s1989_s23 + $0xa0] sm:$0xff]  }
 0x268   : > { %v1712_v28 = vpop.f32.mrf.mxu0 }
 0x269   : > { %v664_v33 = vmax.f32 %v658_v29, 0.0  ;;  %v1890_v28 = vld [vmem:[%s1989_s23 + $0x98] sm:$0xff]  }
 0x26a   : > { %v660_v30 = vpop.f32.mrf.mxu0 }
 0x26b   : > { %v661_v31 = vadd.f32 %v1494_v26, %v660_v30  ;;  %v1888_v26 = vld [vmem:[%s1989_s23 + $0xa8] sm:$0xff]  }
 0x26c   : > { %v1713_v32 = vpop.f32.mrf.mxu0 }
 0x26d   : > { %v665_v34 = vmax.f32 %v661_v31, 0.0 }
 0x26f   : > { %v2031_v35 = vpack.c.bf16 %v665_v34, %v664_v33 }
 0x271   : > { %1715 = vmatpush3.bf16.msra.mxu1 %v2031_v35 }
 0x272   : > { %1720 = vmatprep.subr.bf16.mxu1 %v1902_v0 }
 0x274   : > { %1717 = vmatmul.mubr.msk.bf16.vlgmr.msra.gmra.mxu1 %vm506_vm3, %v2011_v18 }
 0x275   : > { %1721 = vmatpush3.bf16.msra.mxu1 %v1854_v36  ;;  %1736 = vmatprep.mubr.msk.bf16.mxu1 %vm1903_vm0, %v1902_v0 }
 0x276   : > { %1722 = vmatprep.subr.bf16.mxu1 %v1902_v0 }
 0x279   : > { %1723 = vmatpush3.bf16.msra.mxu1 %v1855_v37 }
 0x27a   : > { %1724 = vmatprep.subr.bf16.mxu1 %v1902_v0 }
 0x27d   : > { %1725 = vmatpush3.bf16.msra.mxu1 %v1856_v38  ;;  %v1891_v38 = vld [vmem:[%s1989_s23 + $0x90] sm:$0xff]  }
 0x27e   : > { %1726 = vmatprep.subr.bf16.mxu1 %v1902_v0 }
 0x281   : > { %1727 = vmatpush3.bf16.msra.mxu1 %v1857_v39  ;;  %v1892_v39 = vld [vmem:[%s1989_s23 + $0x88] sm:$0xff]  }
 0x282   : > { %1728 = vmatprep.subr.bf16.mxu1 %v1902_v0 }
 0x285   : > { %1729 = vmatpush3.bf16.msra.mxu1 %v1858_v40  ;;  %v1893_v40 = vld [vmem:[%s1989_s23 + $0x80] sm:$0xff]  }
 0x286   : > { %1730 = vmatprep.subr.bf16.mxu1 %v1902_v0 }
 0x289   : > { %1731 = vmatpush3.bf16.msra.mxu1 %v1859_v41  ;;  %v1580_v41 = vld [vmem:[%s2028_s15 + $0x2] ss:$0 sm:$0xff] }
 0x28a   : > { %1732 = vmatprep.subr.bf16.mxu1 %v1902_v0 }
 0x28d   : > { %1733 = vmatpush3.bf16.msra.mxu1 %v1860_v42 }
 0x28e   : > { %1734 = vmatprep.subr.bf16.mxu1 %v1902_v0 }
 0x291   : > { %1735 = vmatpush3.bf16.msra.mxu1 %v1861_v43 }
 0x292   : > { %1760 = vmatprep.subr.bf16.mxu1 %v1902_v0 }
 0x334   : > { %v717_v50 = vpop.f32.mrf.mxu1 }
 0x336   : > { %v1718_v51 = vpop.f32.mrf.mxu1 }
 0x338   : > { %v720_v52 = vpop.f32.mrf.mxu1 }
 0x339   : > { %v724_v54 = vpack.c.bf16 %v720_v52, %v717_v50 }
 0x33a   : > { %v1719_v55 = vpop.f32.mrf.mxu1 }
 0x33b   : > { %1737 = vmatmul.mubr.bf16.vlgmr.msra.gmra.mxu1 %v724_v54  ;;  %v1613_v55 = vld [vmem:[%s428_s18] ss:$0 sm:$0xff] }
 0x33c   : > { %1761 = vmatpush3.bf16.msra.mxu1 %v1862_v53  ;;  %1776 = vmatprep.mubr.msk.bf16.mxu1 %vm1903_vm0, %v1902_v0 }
 0x33d   : > { %1762 = vmatprep.subr.bf16.mxu1 %v1902_v0 }
 0x340   : > { %1763 = vmatpush3.bf16.msra.mxu1 %v1863_v56 }
 0x341   : > { %1764 = vmatprep.subr.bf16.mxu1 %v1902_v0 }
 0x344   : > { %1765 = vmatpush3.bf16.msra.mxu1 %v1864_v57 }
 0x345   : > { %1766 = vmatprep.subr.bf16.mxu1 %v1902_v0 }
 0x348   : > { %1767 = vmatpush3.bf16.msra.mxu1 %v1865_v58 }
 0x349   : > { %1768 = vmatprep.subr.bf16.mxu1 %v1902_v0 }
 0x34c   : > { %1769 = vmatpush3.bf16.msra.mxu1 %v1866_v59 }
 0x34d   : > { %1770 = vmatprep.subr.bf16.mxu1 %v1902_v0 }
 0x350   : > { %1771 = vmatpush3.bf16.msra.mxu1 %v1867_v60 }
 0x351   : > { %1772 = vmatprep.subr.bf16.mxu1 %v1902_v0 }
 0x354   : > { %1773 = vmatpush3.bf16.msra.mxu1 %v1868_v61 }
 0x355   : > { %1774 = vmatprep.subr.bf16.mxu1 %v1902_v0 }
 0x358   : > { %1775 = vmatpush3.bf16.msra.mxu1 %v1869_v62  ;;  %v1313_v62 = vld [vmem:[%s2156_s1] sm:$0x1] }
 0x359   : > { %1806 = vmatprep.subr.bf16.mxu1 %v1902_v0 }
 0x35b   : > { %1777 = vmatmul.mubr.bf16.vlgmr.msra.gmra.mxu1 %v2031_v35 }
 0x35c   : > { %1822 = vmatprep.mubr.msk.bf16.mxu1 %vm1903_vm0, %v1902_v0  ;;  %1807 = vmatpush3.bf16.msra.mxu1 %v1886_v24 }
 0x35d   : > { %1808 = vmatprep.subr.bf16.mxu1 %v1902_v0 }
 0x360   : > { %1809 = vmatpush3.bf16.msra.mxu1 %v1887_v25 }
 0x361   : > { %1810 = vmatprep.subr.bf16.mxu1 %v1902_v0 }
 0x364   : > { %1811 = vmatpush3.bf16.msra.mxu1 %v1888_v26 }
 0x365   : > { %1812 = vmatprep.subr.bf16.mxu1 %v1902_v0 }
 0x368   : > { %1813 = vmatpush3.bf16.msra.mxu1 %v1889_v27 }
 0x369   : > { %1814 = vmatprep.subr.bf16.mxu1 %v1902_v0 }
 0x36c   : > { %1815 = vmatpush3.bf16.msra.mxu1 %v1890_v28 }
 0x36d   : > { %1816 = vmatprep.subr.bf16.mxu1 %v1902_v0 }
 0x370   : > { %1817 = vmatpush3.bf16.msra.mxu1 %v1891_v38 }
 0x371   : > { %1818 = vmatprep.subr.bf16.mxu1 %v1902_v0 }
 0x374   : > { %1819 = vmatpush3.bf16.msra.mxu1 %v1892_v39 }
 0x375   : > { %1820 = vmatprep.subr.bf16.mxu1 %v1902_v0 }
 0x378   : > { %1821 = vmatpush3.bf16.msra.mxu1 %v1893_v40 }
 0x3fb   : > { %v832_v3 = vpop.f32.mrf.mxu1 }
 0x3fc   : > { %v833_v5 = vadd.f32 %v1521_v2, %v832_v3 }
 0x3fd   : > { %v1738_v4 = vpop.f32.mrf.mxu1 }
 0x3fe   : > { %v839_v9 = vmax.f32 %v833_v5, 0.0 }
 0x3ff   : > { %v835_v6 = vpop.f32.mrf.mxu1 }
 0x400   : > { %v836_v7 = vadd.f32 %v1521_v2, %v835_v6 }
 0x401   : > { %v1739_v8 = vpop.f32.mrf.mxu1 }
 0x402   : > { %v840_v10 = vmax.f32 %v836_v7, 0.0 }
 0x404   : > { %v841_v11 = vpack.c.bf16 %v840_v10, %v839_v9 }
 0x406   : > { %1757 = vmatmul.mubr.bf16.vlgmr.msra.gmra.mxu0 %v841_v11 }
 0x407   : > { %1781 = vmatpush3.bf16.msra.mxu0 %v841_v11  ;;  %1782 = vmatprep.mubr.msk.bf16.mxu0 %vm1903_vm0, %v1902_v0 }
 0x408   : > { %1786 = vmatprep.subr.bf16.mxu0 %v1902_v0 }
 0x40e   : > { %1783 = vmatmul.mubr.msk.bf16.vlgmr.msra.gmra.mxu0 %vm506_vm3, %v2011_v18 }
 0x40f   : > { %1787 = vmatpush3.bf16.msra.mxu0 %v1878_v12  ;;  %1802 = vmatprep.mubr.msk.bf16.mxu0 %vm1903_vm0, %v1902_v0 }
 0x410   : > { %1788 = vmatprep.subr.bf16.mxu0 %v1902_v0 }
 0x413   : > { %1789 = vmatpush3.bf16.msra.mxu0 %v1879_v13 }
 0x414   : > { %1790 = vmatprep.subr.bf16.mxu0 %v1902_v0 }
 0x417   : > { %1791 = vmatpush3.bf16.msra.mxu0 %v1880_v14 }
 0x418   : > { %1792 = vmatprep.subr.bf16.mxu0 %v1902_v0 }
 0x41b   : > { %v2107_v16 = vpop.f32.mrf.mxu1  ;;  %1793 = vmatpush3.bf16.msra.mxu0 %v1881_v15 }
 0x41c   : > { %1794 = vmatprep.subr.bf16.mxu0 %v1902_v0 }
 0x41d   : > { %v1778_v17 = vpop.f32.mrf.mxu1 }
 0x41f   : > { %v2110_v18 = vpop.f32.mrf.mxu1  ;;  %1795 = vmatpush3.bf16.msra.mxu0 %v1882_v20 }
 0x420   : > { %1796 = vmatprep.subr.bf16.mxu0 %v1902_v0 }
 0x421   : > { %v1779_v19 = vpop.f32.mrf.mxu1 }
 0x423   : > { %1797 = vmatpush3.bf16.msra.mxu0 %v1883_v21 }
 0x424   : > { %1798 = vmatprep.subr.bf16.mxu0 %v1902_v0 }
 0x427   : > { %1799 = vmatpush3.bf16.msra.mxu0 %v1884_v22 }
 0x428   : > { %1800 = vmatprep.subr.bf16.mxu0 %v1902_v0 }
 0x42b   : > { %1801 = vmatpush3.bf16.msra.mxu0 %v1885_v23 }
 0x42c   : > { %1826 = vmatprep.subr.bf16.mxu0 %v1902_v0 }
 0x4c6   : > { %v941_v29 = vpop.f32.mrf.mxu0 }
 0x4c7   : > { %v1031_v52 = vadd.f32 %v2107_v16, %v941_v29 }
 0x4c8   : > { %v1758_v30 = vpop.f32.mrf.mxu0 }
 0x4ca   : > { %v944_v31 = vpop.f32.mrf.mxu0 }
 0x4cb   : > { %v1034_v53 = vadd.f32 %v2110_v18, %v944_v31 }
 0x4cc   : > { %v1759_v32 = vpop.f32.mrf.mxu0 }
 0x4ce   : > { %v1071_v33 = vpop.f32.mrf.mxu0 }
 0x4d0   : > { %v1784_v34 = vpop.f32.mrf.mxu0 }
 0x4d2   : > { %v1074_v35 = vpop.f32.mrf.mxu0 }
 0x4d3   : > { %v1078_v36 = vpack.c.bf16 %v1074_v35, %v1071_v33 }
 0x4d4   : > { %v1785_v37 = vpop.f32.mrf.mxu0 }
 0x4d5   : > { %1803 = vmatmul.mubr.bf16.vlgmr.msra.gmra.mxu0 %v1078_v36 }
 0x4d6   : > { %1828 = vmatprep.mubr.msk.bf16.mxu0 %vm1903_vm0, %v1902_v0 }
 0x595   : > { %v1186_v42 = vpop.f32.mrf.mxu0 }
 0x596   : > { %v1187_v44 = vadd.f32 %v1580_v41, %v1186_v42 }
 0x597   : > { %v1804_v43 = vpop.f32.mrf.mxu0 }
 0x598   : > { %v1193_v48 = vmax.f32 %v1187_v44, 0.0 }
 0x599   : > { %v1189_v45 = vpop.f32.mrf.mxu0 }
 0x59a   : > { %v1190_v46 = vadd.f32 %v1580_v41, %v1189_v45 }
 0x59b   : > { %v1805_v47 = vpop.f32.mrf.mxu0 }
 0x59c   : > { %v1194_v49 = vmax.f32 %v1190_v46, 0.0 }
 0x59e   : > { %v1195_v50 = vpack.c.bf16 %v1194_v49, %v1193_v48 }
 0x5a0   : > { %1823 = vmatmul.mubr.bf16.vlgmr.msra.gmra.mxu1 %v1195_v50 }
 0x660   : > { %v1295_v51 = vpop.f32.mrf.mxu1 }
 0x661   : > { %v1302_v54 = vadd.f32 %v1295_v51, %v1031_v52 }
 0x662   : > { %v1824_v0 = vpop.f32.mrf.mxu1 }
 0x663   : > { %v1311_v59 = vadd.f32 %v1613_v55, %v1302_v54 }
 0x664   : > { %v1298_v56 = vpop.f32.mrf.mxu1 }
 0x665   : > { %v1303_v57 = vadd.f32 %v1298_v56, %v1034_v53 }
 0x666   : > { %v1825_v58 = vpop.f32.mrf.mxu1 }
 0x667   : > { %v1312_v60 = vadd.f32 %v1613_v55, %v1303_v57 }
 0x669   : > { %v1314_v61 = vpack.c.bf16 %v1312_v60, %v1311_v59 }
 0x66b   : > { %1827 = vmatpush3.bf16.msra.mxu0 %v1314_v61 }
 0x66e   : > { %1829 = vmatmul.mubr.msk.bf16.vlgmr.msra.gmra.mxu0 %vm506_vm3, %v1313_v62 }
 0x72e   : > { %v1352_v63 = vpop.f32.mrf.mxu0 }
 0x72f   : > { %1358 = vst [vmem:[%s432_s24] sm:$0x3] %v1352_v63 }
 0x730   : > { %v1830_v1 = vpop.f32.mrf.mxu0 }
 0x732   : > { %v1355_v2 = vpop.f32.mrf.mxu0 }
 0x734   : > { %v1831_v3 = vpop.f32.mrf.mxu0 }
 0x735 PF: > { %s19_s30 = sadd.s32 1, %s1900_s30  }
 0x736   : > { %p16_p4 = scmp.ge.s32.totalorder %s19_s30, 4  }
 0x738   :  { %18 = sbr.rel (!%p16_p4) target bundleno = 1 (0x1), region = 110 }

</bundles_post_ra>
